<compile_context>
chip_gen: v7x
topology: tpu7x:2x2x1
jax: 0.10.0
libtpu: 0.0.40
codegen_flags: <defaults>
</compile_context>

<pallas_src>
import functools
import math

import jax
import jax.numpy as jnp
from jax.experimental import pallas as pl
from jax.experimental.pallas import tpu as pltpu


def _round_up(x, m):
    return ((x + m - 1) // m) * m


def _smooth_label_partial_kernel(src_ref, tgt_ref, out_ref, *,
                                 q_true, q_off, tile_rows, n_rows):
    """One grid step: partial_i = sum over this row tile of q[n,v] * src[n,v].

    q_true / q_off / tile_rows / n_rows are Python constants (compile-time literals).
    """
    tgt = tgt_ref[...]                                    # (TR, 1) i32 class indices
    src = src_ref[...].astype(jnp.float32)                # (TR, V) upcast in-kernel (bf16 ok)

    def emit(src_f32):
        # Fused one-hot select on the target column; split form avoids a full q tile.
        col = jax.lax.broadcasted_iota(jnp.int32, src_f32.shape, 1)
        hit = jnp.where(col == tgt, src_f32, 0.0)         # src gathered at the target column
        partial = q_off * jnp.sum(src_f32) + (q_true - q_off) * jnp.sum(hit)
        # Lane-dense (8, 128) store of the per-block partial (wrapper reads [0, 0] of each block).
        out_ref[...] = jnp.full(out_ref.shape, partial, dtype=out_ref.dtype)

    tail_rows = n_rows % tile_rows                        # Python int (0 => grid divides evenly)
    if tail_rows == 0:
        emit(src)
    else:
        last = pl.num_programs(0) - 1
        i = pl.program_id(0)

        @pl.when(i < last)
        def _():
            emit(src)

        @pl.when(i == last)
        def _():
            # Mask rows past N: zeroed rows contribute 0 to both sums, and garbage
            # (out-of-bounds) tgt values in those rows become irrelevant.
            row = jax.lax.broadcasted_iota(jnp.int32, src.shape, 0)
            emit(jnp.where(row < tail_rows, src, 0.0))


def _vmem_plan():
    """Generation-aware (VMEM-capacity-aware) limit + usable byte budget for the src tile."""
    cap = 64 << 20                                        # safe fallback (v7x-sized)
    try:
        info_cap = int(pltpu.get_tpu_info().vmem_capacity_bytes)
        if info_cap > 0:
            cap = info_cap
    except Exception:
        pass
    headroom = 8 << 20                                    # tgt/out double buffers + Mosaic scratch
    limit = max(32 << 20, min(cap - headroom, 96 << 20))  # v7x: 56 MiB; v5e/v6e: 96 MiB
    usable = limit - (4 << 20)
    return limit, usable


def _pick_tile_rows(n_rows, vocab, src_itemsize, usable_vmem_bytes):
    """Largest multiple-of-8 row tile whose double-buffered src block + full-tile
    temporaries (~col iota + select result + upcast, budgeted at 16 B/elem) fit VMEM."""
    per_row = vocab * (2 * src_itemsize + 16)
    tr = max(8, (usable_vmem_bytes // per_row) // 8 * 8)
    # Keep >= ~4 grid steps when N allows, so the "parallel" axis feeds both v7x TensorCores
    # and the pipeline has steps to overlap.
    tr = min(tr, max(8, _round_up(-(-n_rows // 4), 8)))
    tr = min(tr, _round_up(n_rows, 8))
    return tr


def smooth_label_loss(src, tgt, *, n_tokens, smoothing=0.1, ignore_token=None,
                      reduction="mean", tile_rows=None):
    """src: (N, V) float32/bfloat16 log-probs; tgt: (N,) ints. Returns scalar loss (mean/sum)."""
    assert 0.0 <= smoothing <= 1.0
    N, V = src.shape
    assert V == n_tokens

    confidence = 1.0 - smoothing
    uniform = 1.0 / (n_tokens - 1) if ignore_token is not None else 1.0 / n_tokens
    q_off = smoothing * uniform
    q_true = confidence + q_off

    # Host-side constant fold of sum_v q*log(q) for one row (guards 0*log(0) -> 0).
    row_const = 0.0
    if q_true > 0.0:
        row_const += q_true * math.log(q_true)
    if q_off > 0.0:
        row_const += (V - 1) * q_off * math.log(q_off)

    vmem_limit, usable_vmem = _vmem_plan()
    src_itemsize = jnp.dtype(src.dtype).itemsize
    if tile_rows is None:
        tile_rows = _pick_tile_rows(N, V, src_itemsize, usable_vmem)
    assert tile_rows % 8 == 0

    num_blocks = -(-N // tile_rows)                       # ceil-div; no padding of src
    tgt2d = tgt.astype(jnp.int32).reshape(N, 1)

    kernel = functools.partial(
        _smooth_label_partial_kernel,
        q_true=float(q_true), q_off=float(q_off),
        tile_rows=int(tile_rows), n_rows=int(N))

    cost = pl.CostEstimate(
        flops=4 * N * V,
        transcendentals=0,
        bytes_accessed=int(N * V * src_itemsize + N * 4 + num_blocks * 8 * 128 * 4))

    partials = pl.pallas_call(
        kernel,
        out_shape=jax.ShapeDtypeStruct((num_blocks * 8, 128), jnp.float32),
        grid_spec=pltpu.PrefetchScalarGridSpec(
            num_scalar_prefetch=0,
            grid=(num_blocks,),
            in_specs=[
                pl.BlockSpec((tile_rows, V), lambda i: (i, 0)),
                pl.BlockSpec((tile_rows, 1), lambda i: (i, 0)),
            ],
            out_specs=pl.BlockSpec((8, 128), lambda i: (i, 0)),
        ),
        compiler_params=pltpu.CompilerParams(
            # Row-tile axis is independent -> shardable across v7x's 2 TensorCores.
            dimension_semantics=("parallel",),
            vmem_limit_bytes=int(vmem_limit),
        ),
        cost_estimate=cost,
    )(src, tgt2d)

    # One partial per block lives at [8*i, 0]; tiny final reduction in the wrapper.
    total = jnp.float32(N) * jnp.float32(row_const) - jnp.sum(partials[0::8, 0])

    if reduction == "sum":
        return total
    elif reduction == "mean":
        if ignore_token is not None:
            n = jnp.sum(tgt != ignore_token).astype(jnp.float32)
        else:
            n = jnp.float32(tgt.size)
        return total / n
    else:
        raise NotImplementedError("reduction = %r" % reduction)


def _reference_loss(src, tgt, *, n_tokens, smoothing, ignore_token, reduction):
    confidence = 1.0 - smoothing
    uniform = 1.0 / (n_tokens - 1) if ignore_token is not None else 1.0 / n_tokens
    p = jax.nn.one_hot(tgt, n_tokens, dtype=jnp.float32)
    q = confidence * p + smoothing * uniform
    crit = q * (jnp.log(q) - src.astype(jnp.float32))
    if reduction == "mean":
        n = jnp.sum(tgt != ignore_token) if ignore_token is not None else tgt.size
        return crit.sum() / n
    return crit.sum()


if __name__ == "__main__":
    batch, seq, n_tokens = 2, 8, 32
    N = batch * seq

    key = jax.random.PRNGKey(0)
    k_logits, k_tgt = jax.random.split(key)

    logits = jax.random.normal(k_logits, (N, n_tokens), dtype=jnp.float32)
    src = jax.nn.log_softmax(logits, axis=-1)            # log_source=True
    tgt = jax.random.randint(k_tgt, (N,), 0, n_tokens, dtype=jnp.int32)

    # mean reduction, f32 src (tile_rows=8 -> 2 blocks, even grid)
    loss = smooth_label_loss(src, tgt, n_tokens=n_tokens, smoothing=0.1,
                             ignore_token=None, reduction="mean")
    loss = jax.block_until_ready(loss)
    ref = _reference_loss(src, tgt, n_tokens=n_tokens, smoothing=0.1,
                          ignore_token=None, reduction="mean")
    assert jnp.abs(loss - ref) < 1e-4, (loss, ref)

    # sum reduction with ignore_token (only changes uniform + divisor, as in the module)
    loss_s = smooth_label_loss(src, tgt, n_tokens=n_tokens, smoothing=0.1,
                               ignore_token=0, reduction="sum")
    loss_s = jax.block_until_ready(loss_s)
    ref_s = _reference_loss(src, tgt, n_tokens=n_tokens, smoothing=0.1,
                            ignore_token=0, reduction="sum")
    assert jnp.abs(loss_s - ref_s) < 1e-3, (loss_s, ref_s)

    # ragged grid path (N not a multiple of tile_rows) + bf16 src in HBM
    N2 = 13
    src2 = jax.nn.log_softmax(
        jax.random.normal(jax.random.PRNGKey(2), (N2, n_tokens), dtype=jnp.float32), axis=-1)
    tgt2 = jax.random.randint(jax.random.PRNGKey(3), (N2,), 0, n_tokens, dtype=jnp.int32)
    loss_r = smooth_label_loss(src2.astype(jnp.bfloat16), tgt2, n_tokens=n_tokens,
                               smoothing=0.1, ignore_token=None, reduction="mean",
                               tile_rows=8)
    loss_r = jax.block_until_ready(loss_r)
    ref_r = _reference_loss(src2.astype(jnp.bfloat16), tgt2, n_tokens=n_tokens,
                            smoothing=0.1, ignore_token=None, reduction="mean")
    assert jnp.abs(loss_r - ref_r) < 5e-2, (loss_r, ref_r)   # bf16 input tolerance

    print("KERNEL_OK")
</pallas_src>

<mosaic_0001>
module attributes {stable_mosaic.version = 11 : i64} {
  func.func @_smooth_label_partial_kernel(%arg0: i32, %arg1: memref<8x32xf32, #tpu.memory_space<vmem>>, %arg2: memref<8x1xi32, #tpu.memory_space<vmem>>, %arg3: memref<8x128xf32, #tpu.memory_space<vmem>>) attributes {dimension_semantics = [#tpu.dimension_semantics<parallel>], iteration_bounds = array<i64: 2>, scalar_prefetch = 0 : i64, scratch_operands = 0 : i64, tpu.core_type = #tpu.core_type<tc>, window_params = [{transform_indices = @transform_0, window_bounds = array<i64: 8, 32>}, {transform_indices = @transform_1, window_bounds = array<i64: 8, 1>}, {transform_indices = @transform_2, window_bounds = array<i64: 8, 128>}]} {
    %c0 = arith.constant 0 : index
    %c0_0 = arith.constant 0 : index
    %0 = vector.load %arg2[%c0, %c0_0] : memref<8x1xi32, #tpu.memory_space<vmem>>, vector<8x1xi32>
    %c0_1 = arith.constant 0 : index
    %c0_2 = arith.constant 0 : index
    %1 = vector.load %arg1[%c0_1, %c0_2] : memref<8x32xf32, #tpu.memory_space<vmem>>, vector<8x32xf32>
    %2 = tpu.iota {dimensions = array<i32: 1>} : vector<8x32xi32>
    %3 = vector.broadcast %0 : vector<8x1xi32> to vector<8x32xi32>
    %4 = arith.cmpi eq, %2, %3 : vector<8x32xi32>
    %cst = arith.constant 0.000000e+00 : f32
    %5 = vector.broadcast %cst : f32 to vector<8x32xf32>
    %6 = arith.select %4, %1, %5 : vector<8x32xi1>, vector<8x32xf32>
    %7 = vector.shape_cast %1 : vector<8x32xf32> to vector<1x8x32xf32>
    %cst_3 = arith.constant dense<0.000000e+00> : vector<1xf32>
    %8 = vector.multi_reduction <add>, %7, %cst_3 [1, 2] : vector<1x8x32xf32> to vector<1xf32>
    %9 = vector.shape_cast %8 : vector<1xf32> to vector<1x1x1xf32>
    %10 = vector.extract %9[0, 0, 0] : f32 from vector<1x1x1xf32>
    %cst_4 = arith.constant 3.125000e-03 : f32
    %11 = arith.mulf %cst_4, %10 : f32
    %12 = vector.shape_cast %6 : vector<8x32xf32> to vector<1x8x32xf32>
    %cst_5 = arith.constant dense<0.000000e+00> : vector<1xf32>
    %13 = vector.multi_reduction <add>, %12, %cst_5 [1, 2] : vector<1x8x32xf32> to vector<1xf32>
    %14 = vector.shape_cast %13 : vector<1xf32> to vector<1x1x1xf32>
    %15 = vector.extract %14[0, 0, 0] : f32 from vector<1x1x1xf32>
    %cst_6 = arith.constant 0.899999976 : f32
    %16 = arith.mulf %cst_6, %15 : f32
    %17 = arith.addf %11, %16 : f32
    %18 = vector.broadcast %17 : f32 to vector<8x128xf32>
    %c0_7 = arith.constant 0 : index
    %c0_8 = arith.constant 0 : index
    %19 = vector.load %arg3[%c0_7, %c0_8] : memref<8x128xf32, #tpu.memory_space<vmem>>, vector<8x128xf32>
    tpu.vector_store %arg3[%c0_7, %c0_8], %18 {strides = array<i32>} : memref<8x128xf32, #tpu.memory_space<vmem>>, vector<8x128xf32>,
    return
  }
  func.func @transform_0(%arg0: i32) -> (i32, i32) {
    %c0_i32 = arith.constant 0 : i32
    %c0_i32_0 = arith.constant 0 : i32
    return %arg0, %c0_i32 : i32, i32
  }
  func.func @transform_1(%arg0: i32) -> (i32, i32) {
    %c0_i32 = arith.constant 0 : i32
    %c0_i32_0 = arith.constant 0 : i32
    return %arg0, %c0_i32 : i32, i32
  }
  func.func @transform_2(%arg0: i32) -> (i32, i32) {
    %c0_i32 = arith.constant 0 : i32
    %c0_i32_0 = arith.constant 0 : i32
    return %arg0, %c0_i32 : i32, i32
  }
}

</mosaic_0001>

<bundles_post_ra>
// kernel: tpu_custom_call.1
= control target key start
LH: loop header
LB: loop body
LE: loop exit
PB: predicated region body
PF: predicated region fallthrough
CT: control target
= control target key end

     0   :  { %7 = vsyncpa [#allocation3], 0  ;;  %s516_s0 = inlined_call_operand.vmem [shape: f32[16,32], index: 0, kind: input, shape index: {}]   ;;  %s517_s1 = inlined_call_operand.vmem [shape: s32[16,1], index: 1, kind: input, shape index: {}]   ;;  %s518_s2 = inlined_call_operand.hbm [shape: f32[16,128], index: 2, kind: output, shape index: {}]  }
   0x1   :  { %9 = vsyncpa [#allocation3 + $0x1], 0  ;;  %s413_s9 = smov 0   ;;  %s415_s10 = smov 0  }
   0x2   :  { %s417_s11 = smov 0   ;;  %s419_s12 = smov 0  }
   0x3 LB: > { %s434_s13 = sadd.s32 4294967295, %s394_s12   ;;  %s276_s14 = sadd.s32 4294967294, %s394_s12   ;;  %s394_s12 = sphi %s419_s12, %s524_s12   ;;  %s390_s11 = sphi %s417_s11, %s523_s11   ;;  %s386_s10 = sphi %s415_s10, %s522_s10   ;;  %s382_s9 = sphi %s413_s9, %s521_s9  }
   0x4   : > { %s438_s15 = sadd.s32 1, %s394_s12   ;;  %s74_s16 = sadd.s32 1, %s390_s11 }
   0x5   : > { %s71_s17 = ssub.s32 %s394_s12, %s438_s15  ;;  %p84_p0 = scmp.ne.s32.totalorder %s390_s11, %s386_s10 }
   0x6   : > { %p72_p1 = scmp.eq.s32.totalorder %s71_s17, 0  ;;  %p85_p2 = scmp.eq.s32.totalorder %s434_s13, 1 }
   0x7   : > { %p90_p3 = scmp.ne.s32.totalorder %s386_s10, %s382_s9  ;;  %p91_p4 = scmp.eq.s32.totalorder %s276_s14, 1 }
   0x8   : > { %s449_s18 = scalar_select %p72_p1, %s390_s11, %s74_s16  }
   0x9   : > { %p451_p5 = por %p85_p2, %p84_p0  ;;  %p455_p6 = por %p91_p4, %p90_p3 }
   0xa   : > { %p279_p7 = scmp.ge.s32.totalorder %s394_s12, 1  ;;  %p123_p8 = scmp.lt.s32.totalorder %s394_s12, 3 }
   0xc   : > { %p124_p9 = pnand %p279_p7, %p123_p8 }
   0xd   : > { %p148_p10 = scmp.lt.s32.totalorder (!%p124_p9), %s434_s13, 1  ;;  %v396_v0 = vmov (!%p124_p9), 0   ;;  %vm165_vm0 = vcmask (!%p124_p9), 261120   ;;  %v158_v4 = vlaneseq (!%p124_p9)  ;;  %s145_s29 = sand.u32 (!%p124_p9), 1, %s386_s10  }
   0xe   : > { %127 = sbr.rel (%p124_p9) target bundleno = 380 (0x17c), region = 28  ;;  %331 = vset.pattern.permute.xlu0 (!%p124_p9), %v396_v0  ;;  %s280_s30 = sshll.u32 (!%p124_p9), %s145_s29, 3 }
   0xf   : > { %v159_v5 = vand.u32 (!%p124_p9), 127, %v158_v4  ;;  %s284_s4 = sshll.u32 (!%p124_p9), %s434_s13, 7  ;;  %s147_s8 = scalar_lea.vmem (!%p124_p9), [#allocation2], %s280_s30 }
  0x10   : > { %s205_s14 = sshll.u32 (!%p124_p9), %s147_s8, 4  ;;  %s192_s23 = scalar_lea.sflag (!%p124_p9), [#allocation3], %s145_s29  ;;  %s476_s14 = int_to_ptr.vmem [resolvable:$true] %s205_s14 }
  0x11   : > { %s397_s24 = smov (!%p124_p9), [#allocation2]  }
  0x15   : > { %s149_s21 = scalar_select %p148_p10, %s434_s13, 1 }
  0x16   : > { %s332_s13 = scalar_lea.vmem %s476_s14, 128 }
  0x17   : > { %s281_s22 = sshll.u32 %s149_s21, 3  ;;  %p333_p11 = scmp.ne.s32.totalorder %s476_s14, %s332_s13 }
  0x18   : > { %s155_s25 = scalar_lea.vmem %s517_s1, %s281_s22  ;;  %s151_s28 = scalar_lea.vmem %s516_s0, %s281_s22 }
  0x19   : > { %v156_v1 = vld [vmem:[%s155_s25] sm:$0xff]  ;;  %s474_s22 = scalar_lea.hbm %s518_s2, %s284_s4  ;;  %p334_p12 = pnand %p333_p11, %p451_p5 }
  0x1a   : > { %161 = vperm.xlu0 %331, %v156_v1   ;;  %v157_v2 = vld [vmem:[%s151_s28] sm:$0xff]  ;;  %s336_s25 = sshll.u32 %s397_s24, 4  ;;  %s337_s25 = int_to_ptr.vmem [resolvable:$false] %s336_s25 }
  0x1b   : > { %v166_v3 = vsel %vm165_vm0, %v157_v2, 0.0  ;;  %p335_p13 = pneg %p334_p12  ;;  %s338_s26 = scalar_lea.vmem %s337_s25, 256 }
  0x1c   : > { %p339_p0 = scmp.lt.s32.totalorder %s476_s14, %s337_s25  ;;  %p340_p1 = scmp.lt.s32.totalorder %s338_s26, %s332_s13 }
  0x1e   : > { %p341_p2 = por %p340_p1, %p339_p0 }
  0x20   : > { %p342_p3 = pnand %p341_p2, %p335_p13 }
  0x39   : > { %167 = vadd.xlane.f32.xlu0 %v166_v3 }
  0x99   : > { %v162_v6 = vpop.permute.xlu0 %161 }
  0x9a   : > { %vm163_vm1 = vcmp.eq.s32.totalorder %v159_v5, %v162_v6 }
  0x9b   : > { %v164_v7 = vsel %vm163_vm1, %v157_v2, 0.0 }
  0x9c   : > { %v177_v8 = vsel %vm165_vm0, %v164_v7, 0.0 }
  0x9d   : > { %178 = vadd.xlane.f32.xlu1 %v177_v8 }
  0xc6   : > { %v168_v9 = vpop.xlane.xlu0 %167 }
  0xc7   : > { %v169_v10 = vrot.slane %v168_v9, 4 }
  0xc9   : > { %v170_v11 = vadd.f32 %v169_v10, %v168_v9 }
  0xcb   : > { %v171_v12 = vrot.slane %v170_v11, 2 }
  0xcd   : > { %v172_v13 = vadd.f32 %v171_v12, %v170_v11 }
  0xcf   : > { %v173_v14 = vrot.slane %v172_v13, 1 }
  0xd1   : > { %v174_v15 = vadd.f32 %v173_v14, %v172_v13 }
  0xd3   : > { %287 = vpush %v174_v15 }
 0x104   : > { %s288_s3 = spop %287 }
 0x105   : > { %s176_s5 = smul.f32 0.003125, %s288_s3 }
 0x12a   : > { %v179_v16 = vpop.xlane.xlu1 %178 }
 0x12b   : > { %v180_v17 = vrot.slane %v179_v16, 4 }
 0x12d   : > { %v181_v18 = vadd.f32 %v180_v17, %v179_v16 }
 0x12f   : > { %v182_v19 = vrot.slane %v181_v18, 2 }
 0x131   : > { %v183_v20 = vadd.f32 %v182_v19, %v181_v18 }
 0x133   : > { %v184_v21 = vrot.slane %v183_v20, 1 }
 0x135   : > { %v185_v22 = vadd.f32 %v184_v21, %v183_v20 }
 0x137   : > { %289 = vpush %v185_v22 }
 0x168   : > { %s290_s6 = spop %289 }
 0x169   : > { %s187_s7 = smul.f32 0.9, %s290_s6 }
 0x16b   : > { %s188_s16 = sadd.f32 %s187_s7, %s176_s5 }
 0x16d   : > { %v189_v23 = vstv %s188_s16 }
 0x16e   : > { %190 = vst [vmem:[%s147_s8] sm:$0xff] %v189_v23 }
 0x16f   : > { %345 = shalt.err (!%p342_p3)
}
 0x170   : > { %s346_s27 = scalar_lea.hbm %s474_s22, 128  ;;  %s350_s30 = scalar_lea.hbm %s518_s2, 256 }
 0x171   : > { %p347_p4 = scmp.ne.s32.totalorder %s474_s22, %s346_s27  ;;  %p351_p9 = scmp.lt.u32.totalorder %s474_s22, %s518_s2 }
 0x172   : > { %p352_p10 = scmp.lt.u32.totalorder %s350_s30, %s346_s27  ;;  %p354_p12 = scmp.lt.u32.totalorder %s346_s27, %s474_s22 }
 0x173   : > { %p348_p7 = pnand %p347_p4, %p451_p5 }
 0x174   : > { %p353_p11 = por %p352_p10, %p351_p9 }
 0x175   : > { %p349_p8 = pneg %p348_p7 }
 0x176   : > { %p355_p13 = por %p354_p12, %p353_p11 }
 0x178   : > { %p356_p0 = pnand %p355_p13, %p349_p8 }
 0x17a   : > { %359 = shalt.err (!%p356_p0)
}
 0x17b   : > { %291 = dma.vmem_to_hbm [thread:$0]  (%p451_p5), %s476_s14, 128, %s474_s22, %s192_s23  }
 0x17c PF: > { %p297_p1 = scmp.ge.s32.totalorder %s394_s12, 2  ;;  %s217_s5 = sand.u32 1, %s382_s9  }
 0x17d   : > { %s218_s6 = scalar_lea.sflag [#allocation3], %s217_s5 }
 0x17e   : > { %p294_p2 = pnand %p297_p1, %p455_p6 }
 0x180   : > { %377 = dma.done.wait (!%p294_p2), %s218_s6, 128  }
 0x181   : > { %379 = vsyncadd (!%p294_p2), %s218_s6, 4294967168  ;;  %p12_p3 = scmp.ge.s32.totalorder %s438_s15, 4   ;;  %s521_s9 = smov %s386_s10 }
 0x182   : > { %s522_s10 = smov %s390_s11  ;;  %s523_s11 = smov %s449_s18 }
 0x183   : > { %s524_s12 = smov %s438_s15  ;;  %14 = sbr.rel (!%p12_p3) target bundleno = 3 (0x3), region = 66 }
 0x18a   :  { %223 = vsyncpa [#allocation3], 1 }
 0x18b   :  { %225 = vsyncpa [#allocation3 + $0x1], 1 }

</bundles_post_ra>
